<compile_context>
chip_gen: v7x
topology: tpu7x:2x2x1
jax: 0.10.0
libtpu: 0.0.40
codegen_flags: <defaults>
</compile_context>

<pallas_src>
import functools

import jax
import jax.numpy as jnp
from jax.experimental import pallas as pl
from jax.experimental.pallas import tpu as pltpu

LANE = 128
SUBLANE = 8


def _round_up(x, m):
    return ((x + m - 1) // m) * m


def _is_small_int(g):
    g = float(g)
    return g.is_integer() and 0.0 <= g <= 8.0


def _focal_elementwise(x, t, alpha, gamma):
    """Per-element focal loss in f32 (numerically stable BCE-with-logits)."""
    x = x.astype(jnp.float32)
    t = t.astype(jnp.float32)
    # Same as F.binary_cross_entropy_with_logits (reduction='none'):
    #   bce = max(x, 0) - x*t + log(1 + exp(-|x|))
    bce = jnp.maximum(x, 0.0) - x * t + jnp.log1p(jnp.exp(-jnp.abs(x)))
    pt = jnp.exp(-bce)
    q = 1.0 - pt
    if _is_small_int(gamma):
        # Integer gamma (default gamma=2): repeated VPU multiplies instead of
        # pow == exp(gamma*log(.)) which would add 2 EUP transcendentals/elem.
        mod = jnp.ones_like(q)
        for _ in range(int(float(gamma))):
            mod = mod * q
    else:
        mod = q ** jnp.float32(gamma)
    return jnp.float32(alpha) * mod * bce


def _focal_partial_sum_kernel(x_ref, t_ref, psum_ref, *, alpha, gamma,
                              row_tile, n_total, needs_mask):
    focal = _focal_elementwise(x_ref[...], t_ref[...], alpha, gamma)
    if needs_mask:
        # Zero out: (a) explicit zero padding in [n_total, rows_padded*128),
        # which would otherwise contribute alpha*(1/2)^g*log(2) each, and
        # (b) Pallas-padded garbage rows of a ragged last block (jnp.where
        # never propagates NaN/inf from the unselected branch).
        # int32 global index: fine for tensors up to ~2^31 elements.
        row_ids = jax.lax.broadcasted_iota(jnp.int32, focal.shape, 0)
        lane_ids = jax.lax.broadcasted_iota(jnp.int32, focal.shape, 1)
        gidx = pl.program_id(0) * (row_tile * LANE) + row_ids * LANE + lane_ids
        focal = jnp.where(gidx < n_total, focal, 0.0)
    # vreg-shaped partial sum: (row_tile,128) -> (row_tile/8, 8, 128) -> add
    # the leading axis.  Pure VPU adds; the cross-lane reduce happens once in
    # the wrapper over the tiny partials array.
    psum_ref[...] = jnp.sum(
        focal.reshape(row_tile // SUBLANE, SUBLANE, LANE), axis=0)


def _focal_elem_kernel(x_ref, t_ref, out_ref, *, alpha, gamma):
    out_ref[...] = _focal_elementwise(
        x_ref[...], t_ref[...], alpha, gamma).astype(out_ref.dtype)


def focal_loss(inputs, targets, alpha=1.0, gamma=2.0, reduction="mean",
               row_tile=2048):
    """Pallas implementation of FocalLoss.forward."""
    assert inputs.shape == targets.shape
    assert reduction in ("mean", "sum", "none")
    n_total = int(inputs.size)

    # Layout: flatten to (rows_padded, 128), rows padded only to a multiple of
    # 8 sublanes (never to a multiple of the block) so that nicely sized
    # tensors (multiples of 1024 elements) need no wrapper-side copy at all.
    rows_needed = pl.cdiv(max(n_total, 1), LANE)
    rows_padded = _round_up(rows_needed, SUBLANE)
    row_tile = max(SUBLANE, min(_round_up(int(row_tile), SUBLANE), rows_padded))
    num_blocks = pl.cdiv(rows_padded, row_tile)        # last block may be ragged
    n_arr = rows_padded * LANE                          # elements in padded array
    n_grid = num_blocks * row_tile * LANE               # elements the grid touches
    needs_mask = n_grid != n_total

    def to2d(a):
        flat = a.reshape(-1)
        pad = n_arr - n_total
        if pad:
            flat = jnp.pad(flat, (0, pad))               # only when not /1024
        return flat.reshape(rows_padded, LANE)

    x2d = to2d(inputs)
    t2d = to2d(targets)

    in_bytes = x2d.size * x2d.dtype.itemsize + t2d.size * t2d.dtype.itemsize
    n_transc = (3 if _is_small_int(gamma) else 5) * n_grid

    in_specs = [
        pl.BlockSpec((row_tile, LANE), lambda i: (i, 0)),
        pl.BlockSpec((row_tile, LANE), lambda i: (i, 0)),
    ]
    compiler_params = pltpu.CompilerParams(
        dimension_semantics=("parallel",),  # independent blocks -> megacore OK
    )

    if reduction == "none":
        out_dtype = inputs.dtype
        out = pl.pallas_call(
            functools.partial(_focal_elem_kernel, alpha=alpha, gamma=gamma),
            out_shape=jax.ShapeDtypeStruct((rows_padded, LANE), out_dtype),
            grid_spec=pltpu.PrefetchScalarGridSpec(
                num_scalar_prefetch=0,
                grid=(num_blocks,),
                in_specs=in_specs,
                out_specs=pl.BlockSpec((row_tile, LANE), lambda i: (i, 0)),
            ),
            compiler_params=compiler_params,
            cost_estimate=pl.CostEstimate(
                flops=14 * n_grid,
                transcendentals=n_transc,
                bytes_accessed=in_bytes + n_arr * jnp.dtype(out_dtype).itemsize,
            ),
        )(x2d, t2d)
        if n_arr == n_total:
            return out.reshape(inputs.shape)          # no tail slice copy
        return out.reshape(-1)[:n_total].reshape(inputs.shape)

    partials = pl.pallas_call(
        functools.partial(_focal_partial_sum_kernel, alpha=alpha, gamma=gamma,
                          row_tile=row_tile, n_total=n_total,
                          needs_mask=needs_mask),
        out_shape=jax.ShapeDtypeStruct((num_blocks * SUBLANE, LANE),
                                       jnp.float32),
        grid_spec=pltpu.PrefetchScalarGridSpec(
            num_scalar_prefetch=0,
            grid=(num_blocks,),
            in_specs=in_specs,
            # Lane-dense (8,128) partial-sum block per grid step.
            out_specs=pl.BlockSpec((SUBLANE, LANE), lambda i: (i, 0)),
        ),
        compiler_params=compiler_params,
        cost_estimate=pl.CostEstimate(
            flops=15 * n_grid,
            transcendentals=n_transc,
            bytes_accessed=in_bytes + num_blocks * SUBLANE * LANE * 4,
        ),
    )(x2d, t2d)

    total = jnp.sum(partials)  # tiny final XLU reduce, once
    if reduction == "sum":
        return total
    return total / jnp.float32(n_total)


def focal_loss_ref(inputs, targets, alpha=1.0, gamma=2.0, reduction="mean"):
    x = inputs.astype(jnp.float32)
    t = targets.astype(jnp.float32)
    bce = jnp.maximum(x, 0.0) - x * t + jnp.log1p(jnp.exp(-jnp.abs(x)))
    pt = jnp.exp(-bce)
    fl = alpha * (1.0 - pt) ** gamma * bce
    if reduction == "mean":
        return jnp.mean(fl)
    if reduction == "sum":
        return jnp.sum(fl)
    return fl


if __name__ == "__main__":
    key = jax.random.PRNGKey(0)
    k1, k2, k3, k4, k5, k6 = jax.random.split(key, 6)

    # NCHW inputs consistent with a segmentation-style focal loss use.
    shape = (2, 4, 16, 16)
    logits = jax.random.normal(k1, shape, dtype=jnp.float32) * 2.0
    targets = (jax.random.uniform(k2, shape) > 0.5).astype(jnp.float32)

    out = focal_loss(logits, targets, alpha=1.0, gamma=2.0, reduction="mean")
    out = jax.block_until_ready(out)
    ref = focal_loss_ref(logits, targets)
    assert jnp.allclose(out, ref, rtol=1e-5, atol=1e-6), (out, ref)

    # Odd element count (not a multiple of 128) exercises the pad-and-mask path.
    shape2 = (2, 3, 7, 5)
    logits2 = jax.random.normal(k3, shape2, dtype=jnp.float32) * 2.0
    targets2 = (jax.random.uniform(k4, shape2) > 0.5).astype(jnp.float32)
    out2 = jax.block_until_ready(focal_loss(logits2, targets2))
    ref2 = focal_loss_ref(logits2, targets2)
    assert jnp.allclose(out2, ref2, rtol=1e-5, atol=1e-6), (out2, ref2)

    # 'sum' reduction sanity check.
    out3 = jax.block_until_ready(focal_loss(logits, targets, reduction="sum"))
    ref3 = focal_loss_ref(logits, targets, reduction="sum")
    assert jnp.allclose(out3, ref3, rtol=1e-5, atol=1e-5), (out3, ref3)

    # Ragged last grid block (rows not a multiple of row_tile): mean + 'none'.
    shape3 = (3, 1024)   # 24 rows of 128; row_tile=16 -> second block ragged
    logits3 = jax.random.normal(k5, shape3, dtype=jnp.float32) * 2.0
    targets3 = (jax.random.uniform(k6, shape3) > 0.5).astype(jnp.float32)
    out4 = jax.block_until_ready(
        focal_loss(logits3, targets3, reduction="mean", row_tile=16))
    ref4 = focal_loss_ref(logits3, targets3, reduction="mean")
    assert jnp.allclose(out4, ref4, rtol=1e-5, atol=1e-6), (out4, ref4)

    out5 = jax.block_until_ready(
        focal_loss(logits3, targets3, reduction="none", row_tile=16))
    ref5 = focal_loss_ref(logits3, targets3, reduction="none")
    assert out5.shape == shape3
    assert jnp.allclose(out5, ref5, rtol=1e-5, atol=1e-5)

    print("KERNEL_OK")
</pallas_src>

<mosaic_0001>
module attributes {stable_mosaic.version = 11 : i64} {
  func.func @_focal_partial_sum_kernel(%arg0: i32, %arg1: memref<16x128xf32, #tpu.memory_space<vmem>>, %arg2: memref<16x128xf32, #tpu.memory_space<vmem>>, %arg3: memref<8x128xf32, #tpu.memory_space<vmem>>) attributes {dimension_semantics = [#tpu.dimension_semantics<parallel>], iteration_bounds = array<i64: 1>, scalar_prefetch = 0 : i64, scratch_operands = 0 : i64, tpu.core_type = #tpu.core_type<tc>, window_params = [{transform_indices = @transform_0, window_bounds = array<i64: 16, 128>}, {transform_indices = @transform_1, window_bounds = array<i64: 16, 128>}, {transform_indices = @transform_2, window_bounds = array<i64: 8, 128>}]} {
    %c0 = arith.constant 0 : index
    %c0_0 = arith.constant 0 : index
    %0 = vector.load %arg1[%c0, %c0_0] : memref<16x128xf32, #tpu.memory_space<vmem>>, vector<16x128xf32>
    %c0_1 = arith.constant 0 : index
    %c0_2 = arith.constant 0 : index
    %1 = vector.load %arg2[%c0_1, %c0_2] : memref<16x128xf32, #tpu.memory_space<vmem>>, vector<16x128xf32>
    %cst = arith.constant 0.000000e+00 : f32
    %2 = vector.broadcast %cst : f32 to vector<16x128xf32>
    %3 = arith.maximumf %0, %2 : vector<16x128xf32>
    %4 = arith.mulf %0, %1 : vector<16x128xf32>
    %5 = arith.subf %3, %4 : vector<16x128xf32>
    %6 = math.absf %0 : vector<16x128xf32>
    %cst_3 = arith.constant 0.000000e+00 : f32
    %7 = vector.broadcast %cst_3 : f32 to vector<16x128xf32>
    %8 = arith.subf %7, %6 : vector<16x128xf32>
    %9 = math.exp %8 : vector<16x128xf32>
    %10 = math.log1p %9 : vector<16x128xf32>
    %11 = arith.addf %5, %10 : vector<16x128xf32>
    %cst_4 = arith.constant 0.000000e+00 : f32
    %12 = vector.broadcast %cst_4 : f32 to vector<16x128xf32>
    %13 = arith.subf %12, %11 : vector<16x128xf32>
    %14 = math.exp %13 : vector<16x128xf32>
    %cst_5 = arith.constant 1.000000e+00 : f32
    %15 = vector.broadcast %cst_5 : f32 to vector<16x128xf32>
    %16 = arith.subf %15, %14 : vector<16x128xf32>
    %cst_6 = arith.constant 1.000000e+00 : f32
    %17 = vector.broadcast %cst_6 : f32 to vector<16x128xf32>
    %18 = arith.mulf %17, %16 : vector<16x128xf32>
    %19 = arith.mulf %18, %16 : vector<16x128xf32>
    %cst_7 = arith.constant 1.000000e+00 : f32
    %20 = vector.broadcast %cst_7 : f32 to vector<16x128xf32>
    %21 = arith.mulf %20, %19 : vector<16x128xf32>
    %22 = arith.mulf %21, %11 : vector<16x128xf32>
    %23 = vector.shape_cast %22 : vector<16x128xf32> to vector<2x8x128xf32>
    %cst_8 = arith.constant dense<0.000000e+00> : vector<8x128xf32>
    %24 = vector.multi_reduction <add>, %23, %cst_8 [0] : vector<2x8x128xf32> to vector<8x128xf32>
    %c0_9 = arith.constant 0 : index
    %c0_10 = arith.constant 0 : index
    %25 = vector.load %arg3[%c0_9, %c0_10] : memref<8x128xf32, #tpu.memory_space<vmem>>, vector<8x128xf32>
    tpu.vector_store %arg3[%c0_9, %c0_10], %24 {strides = array<i32>} : memref<8x128xf32, #tpu.memory_space<vmem>>, vector<8x128xf32>,
    return
  }
  func.func @transform_0(%arg0: i32) -> (i32, i32) {
    %c0_i32 = arith.constant 0 : i32
    %c0_i32_0 = arith.constant 0 : i32
    return %arg0, %c0_i32 : i32, i32
  }
  func.func @transform_1(%arg0: i32) -> (i32, i32) {
    %c0_i32 = arith.constant 0 : i32
    %c0_i32_0 = arith.constant 0 : i32
    return %arg0, %c0_i32 : i32, i32
  }
  func.func @transform_2(%arg0: i32) -> (i32, i32) {
    %c0_i32 = arith.constant 0 : i32
    %c0_i32_0 = arith.constant 0 : i32
    return %arg0, %c0_i32 : i32, i32
  }
}

</mosaic_0001>

<bundles_post_ra>
// kernel: tpu_custom_call.1
= control target key start
LH: loop header
LB: loop body
LE: loop exit
PB: predicated region body
PF: predicated region fallthrough
CT: control target
= control target key end

     0   :  { %7 = vsyncpa [#allocation3], 0  ;;  %s253_s0 = inlined_call_operand.hbm [shape: f32[16,128], index: 0, kind: input, shape index: {}]   ;;  %s254_s1 = inlined_call_operand.hbm [shape: f32[16,128], index: 1, kind: input, shape index: {}]   ;;  %s255_s2 = inlined_call_operand.hbm [shape: f32[8,128], index: 2, kind: output, shape index: {}]  }
   0x1   :  { %8 = vsyncpa [#allocation6], 0 }
   0x2   :  { %9 = vsyncpa [#allocation4], 0  ;;  %s197_s9 = smov [#allocation2]   ;;  %s125_s13 = scalar_lea.hbm %s253_s0, 256 }
   0x3   :  { %s15_s10 = sshll.u32 %s197_s9, 4  ;;  %p126_p0 = scmp.ne.s32.totalorder %s253_s0, %s125_s13  ;;  %s16_s10 = int_to_ptr.vmem [resolvable:$true] %s15_s10 }
   0x4   :  { %p129_p1 = scmp.lt.u32.totalorder %s125_s13, %s253_s0 }
   0x6   :  { %p131_p2 = pnand %p129_p1, %p126_p0 }
   0x8   :  { %134 = shalt.err (!%p131_p2)
}
   0x9   :  { %s135_s18 = scalar_lea.vmem %s16_s10, 256  ;;  %p140_p4 = scmp.lt.s32.totalorder %s16_s10, %s16_s10 }
   0xa   :  { %p136_p3 = scmp.ne.s32.totalorder %s16_s10, %s135_s18  ;;  %p141_p5 = scmp.lt.s32.totalorder %s135_s18, %s135_s18 }
   0xc   :  { %p142_p6 = por %p141_p5, %p140_p4 }
   0xe   :  { %p143_p7 = pnand %p142_p6, %p136_p3 }
  0x10   :  { %146 = shalt.err (!%p143_p7)
}
  0x11   :  { %s198_s19 = smov 128   ;;  %s199_s20 = smov 8  }
  0x12   :  { %21 = dma.hbm_to_vmem [thread:$0]  %s253_s0, 256, %s16_s10, [#allocation3], %s198_s19, %s198_s19, %s199_s20  }
  0x13   :  { %s200_s23 = smov [#allocation5]   ;;  %s147_s27 = scalar_lea.hbm %s254_s1, 256 }
  0x14   :  { %s27_s24 = sshll.u32 %s200_s23, 4  ;;  %p148_p8 = scmp.ne.s32.totalorder %s254_s1, %s147_s27  ;;  %s28_s24 = int_to_ptr.vmem [resolvable:$true] %s27_s24 }
  0x15   :  { %p151_p9 = scmp.lt.u32.totalorder %s147_s27, %s254_s1 }
  0x17   :  { %p153_p10 = pnand %p151_p9, %p148_p8 }
  0x19   :  { %156 = shalt.err (!%p153_p10)
}
  0x1a   :  { %s157_s4 = scalar_lea.vmem %s28_s24, 256  ;;  %p162_p12 = scmp.lt.s32.totalorder %s28_s24, %s28_s24 }
  0x1b   :  { %p158_p11 = scmp.ne.s32.totalorder %s28_s24, %s157_s4  ;;  %p163_p13 = scmp.lt.s32.totalorder %s157_s4, %s157_s4 }
  0x1d   :  { %p164_p0 = por %p163_p13, %p162_p12 }
  0x1f   :  { %p165_p1 = pnand %p164_p0, %p158_p11 }
  0x21   :  { %168 = shalt.err (!%p165_p1)
}
  0x22   :  { %33 = dma.hbm_to_vmem [thread:$0]  %s254_s1, 256, %s28_s24, [#allocation6], %s198_s19, %s198_s19, %s199_s20  }
  0x23   :  { %191 = dma.done.wait [#allocation3], 256  }
  0x24   :  { %192 = vsyncadd [#allocation3], 4294967040 }
  0x25   :  { %193 = dma.done.wait [#allocation6], 256  }
  0x26   :  { %194 = vsyncadd [#allocation6], 4294967040  ;;  %v40_v0 = vld [vmem:[#allocation2] sm:$0xff]  ;;  %v41_v1 = vld [vmem:[#allocation2 + $0x8] sm:$0xff]  ;;  %s201_s1 = smov [#allocation7]  }
  0x27   :  { %v50_v2 = vand.u32 2147483647, %v40_v0  ;;  %v51_v3 = vand.u32 2147483647, %v41_v1  ;;  %v42_v14 = vld [vmem:[#allocation5] sm:$0xff]  ;;  %v43_v15 = vld [vmem:[#allocation5 + $0x8] sm:$0xff] }
  0x28   :  { %v44_v17 = vmax.f32 %v40_v0, 0.0  ;;  %v46_v18 = vmul.f32 %v42_v14, %v40_v0  ;;  %v45_v21 = vmax.f32 %v41_v1, 0.0  ;;  %v47_v22 = vmul.f32 %v43_v15, %v41_v1  ;;  %s98_s6 = sshll.u32 %s201_s1, 4  ;;  %s99_s6 = int_to_ptr.vmem [resolvable:$true] %s98_s6 }
  0x29   :  { %v52_v4 = vsub.f32 0.0, %v50_v2  ;;  %v53_v5 = vsub.f32 0.0, %v51_v3  ;;  %s169_s7 = scalar_lea.vmem %s99_s6, 128  ;;  %p174_p3 = scmp.lt.s32.totalorder %s99_s6, %s99_s6 }
  0x2a   :  { %v48_v26 = vsub.f32 %v44_v17, %v46_v18  ;;  %v49_v29 = vsub.f32 %v45_v21, %v47_v22  ;;  %p170_p2 = scmp.ne.s32.totalorder %s99_s6, %s169_s7  ;;  %p175_p4 = scmp.lt.s32.totalorder %s169_s7, %s169_s7 }
  0x2b   :  { %v54_v6 = vmul.f32 1.442695, %v52_v4  ;;  %v56_v7 = vmul.f32 1.442695, %v53_v5 }
  0x2c   :  { %p176_p5 = por %p175_p4, %p174_p3 }
  0x2d   :  { %113 = vpow2.f32 %v54_v6 }
  0x2e   :  { %115 = vpow2.f32 %v56_v7  ;;  %p177_p6 = pnand %p176_p5, %p170_p2 }
  0x37   :  { %v114_v8 = vpop.eup %113 }
  0x38   :  { %v116_v9 = vpop.eup %115  ;;  %v58_v10 = vadd.f32 1.0, %v114_v8  ;;  %v61_v12 = vmul.f32 -0.5, %v114_v8  ;;  %v64_v19 = vand.u32 2147483647, %v114_v8 }
  0x39   :  { %v67_v11 = vadd.f32 1.0, %v116_v9  ;;  %v70_v13 = vmul.f32 -0.5, %v116_v9  ;;  %v73_v23 = vand.u32 2147483647, %v116_v9 }
  0x3a   :  { %117 = vlog2.f32 %v58_v10  ;;  %v62_v16 = vadd.f32 1.0, %v61_v12  ;;  %vm65_vm0 = vcmp.lt.f32.partialorder %v64_v19, 0.0004427343 }
  0x3b   :  { %119 = vlog2.f32 %v67_v11  ;;  %v71_v20 = vadd.f32 1.0, %v70_v13  ;;  %vm74_vm1 = vcmp.lt.f32.partialorder %v73_v23, 0.0004427343 }
  0x3c   :  { %v63_v24 = vmul.f32 %v114_v8, %v62_v16 }
  0x3d   :  { %v72_v27 = vmul.f32 %v116_v9, %v71_v20 }
  0x44   :  { %v118_v25 = vpop.eup %117 }
  0x45   :  { %v120_v28 = vpop.eup %119  ;;  %v60_v30 = vmul.f32 0.6931472, %v118_v25 }
  0x46   :  { %v69_v31 = vmul.f32 0.6931472, %v120_v28 }
  0x47   :  { %v66_v32 = vsel %vm65_vm0, %v63_v24, %v60_v30 }
  0x48   :  { %v75_v33 = vsel %vm74_vm1, %v72_v27, %v69_v31  ;;  %v76_v34 = vadd.f32 %v66_v32, %v48_v26 }
  0x49   :  { %v77_v35 = vadd.f32 %v75_v33, %v49_v29 }
  0x4a   :  { %v78_v36 = vsub.f32 0.0, %v76_v34 }
  0x4b   :  { %v79_v37 = vsub.f32 0.0, %v77_v35 }
  0x4c   :  { %v80_v38 = vmul.f32 1.442695, %v78_v36 }
  0x4d   :  { %v82_v39 = vmul.f32 1.442695, %v79_v37 }
  0x4e   :  { %121 = vpow2.f32 %v80_v38 }
  0x4f   :  { %123 = vpow2.f32 %v82_v39 }
  0x58   :  { %v122_v40 = vpop.eup %121 }
  0x59   :  { %v124_v41 = vpop.eup %123  ;;  %v84_v42 = vsub.f32 1.0, %v122_v40 }
  0x5a   :  { %v85_v43 = vsub.f32 1.0, %v124_v41 }
  0x5b   :  { %v86_v44 = vmul.f32 %v84_v42, %v84_v42 }
  0x5c   :  { %v87_v45 = vmul.f32 %v85_v43, %v85_v43 }
  0x5d   :  { %v88_v46 = vmul.f32 %v86_v44, %v76_v34 }
  0x5e   :  { %v89_v47 = vmul.f32 %v87_v45, %v77_v35 }
  0x60   :  { %v90_v48 = vadd.f32 %v89_v47, %v88_v46 }
  0x62   :  { %91 = vst [vmem:[#allocation7] sm:$0xff] %v90_v48 }
  0x63   :  { %180 = shalt.err (!%p177_p6)
}
  0x64   :  { %s181_s10 = scalar_lea.hbm %s255_s2, 128 }
  0x65   :  { %p182_p7 = scmp.ne.s32.totalorder %s255_s2, %s181_s10  ;;  %p185_p8 = scmp.lt.u32.totalorder %s181_s10, %s255_s2 }
  0x67   :  { %p187_p9 = pnand %p185_p8, %p182_p7 }
  0x69   :  { %190 = shalt.err (!%p187_p9)
}
  0x6a   :  { %101 = dma.vmem_to_hbm [thread:$0]  %s99_s6, 128, %s255_s2, [#allocation4]  }
  0x6b   :  { %195 = dma.done.wait [#allocation4], 128  }
  0x6c   :  { %196 = vsyncadd [#allocation4], 4294967168 }
  0x6d   :  { %105 = vsyncpa [#allocation3], 1 }
  0x6e   :  { %106 = vsyncpa [#allocation6], 1 }
  0x6f   :  { %107 = vsyncpa [#allocation4], 1 }

</bundles_post_ra>
